<compile_context>
chip_gen: v7x
topology: tpu7x:2x2x1
jax: 0.10.0
libtpu: 0.0.40
codegen_flags: <defaults>
</compile_context>

<pallas_src>
import jax
import jax.numpy as jnp
from jax import lax
from jax.experimental import pallas as pl
from jax.experimental.pallas import tpu as pltpu


# ----------------------------- Pallas kernel ------------------------------ #

def value_net_kernel(x_ref, w1_ref, b1_ref, w2_ref, b2_ref, w3_ref, b3_ref,
                     o_ref):
    """One batch tile, fully in VMEM, batch on the lane axis.

    h1 = tanh(W1 · xᵀ + b1)          (H, TB)
    h2 = tanh(W2 · h1 + b2)          (H, TB)
    v  = sum_h(h2 * w3_col) + b3     (1, TB)   VPU mul + sublane reduce
    """
    x = x_ref[...]                                            # (TB, D)
    # (H, D) x (TB, D) contracted over D -> (H, TB).  Same math as torch
    # Linear's x @ W1ᵀ, computed transposed so batch stays on lanes.
    h1 = jnp.tanh(
        lax.dot_general(w1_ref[...], x, (((1,), (1,)), ((), ())),
                        preferred_element_type=jnp.float32)
        + b1_ref[...])                                        # (H, TB)
    # Standard matmul: (H, H) @ (H, TB) -> (H, TB).
    h2 = jnp.tanh(
        lax.dot_general(w2_ref[...], h1, (((1,), (0,)), ((), ())),
                        preferred_element_type=jnp.float32)
        + b2_ref[...])                                        # (H, TB)
    # Final 1-unit head: keep the MXU out of the N=1 tail.
    v = jnp.sum(h2 * w3_ref[...], axis=0, keepdims=True) + b3_ref[0]   # (1, TB)
    o_ref[...] = v.astype(o_ref.dtype)


# ------------------------------- wrapper ----------------------------------- #

def value_network_forward(x, params, *, batch_tile=None):
    """x: [B, shape_in] -> [B, 1] float32.

    params = (w1, b1, w2, b2, w3, b3) with shapes (torch Linear layout)
      w1: (H, D)  b1: (H, 1)  w2: (H, H)  b2: (H, 1)  w3: (H, 1)  b3: (1,)

    batch_tile: None -> single grid step (best on v5e/v6e; default).
                A multiple of 128 dividing B -> multi-tile "parallel" grid
                (only useful for v7x's two TensorCores at larger batches).
    """
    w1, b1, w2, b2, w3, b3 = params
    B, D = x.shape
    H = w1.shape[0]

    TB = B if batch_tile is None else batch_tile
    assert B % TB == 0, (B, TB)
    num_tiles = B // TB
    if num_tiles > 1:
        # Lane-dense tiles: x block (TB, D) needs TB % 8 == 0, output block
        # (1, TB) needs TB % 128 == 0 for clean unmasked stores.
        assert TB % 128 == 0, "multi-tile grids need batch_tile % 128 == 0"

    x_c = x.astype(jnp.float32)
    w1_c = w1.astype(jnp.float32)
    w2_c = w2.astype(jnp.float32)
    w3_c = w3.astype(jnp.float32)
    b1_c = b1.astype(jnp.float32)
    b2_c = b2.astype(jnp.float32)
    b3_c = b3.astype(jnp.float32).reshape((1,))

    in_specs = [
        pl.BlockSpec((TB, D), lambda i: (i, 0)),            # x tile (streamed)
        pl.BlockSpec((H, D), lambda i: (0, 0)),              # W1 (resident)
        pl.BlockSpec((H, 1), lambda i: (0, 0)),              # b1 column
        pl.BlockSpec((H, H), lambda i: (0, 0)),              # W2
        pl.BlockSpec((H, 1), lambda i: (0, 0)),              # b2 column
        pl.BlockSpec((H, 1), lambda i: (0, 0)),              # w3 column
        pl.BlockSpec(memory_space=pltpu.MemorySpace.SMEM),   # b3 scalar
    ]
    # Lane-dense output: each tile writes a (1, TB) row of the (1, B) slab.
    out_spec = pl.BlockSpec((1, TB), lambda i: (0, i))

    weight_bytes = 4 * (w1.size + w2.size + w3.size + b1.size + b2.size + 1)
    cost = pl.CostEstimate(
        flops=2 * B * (D * H + H * H + H),
        transcendentals=2 * B * H,
        bytes_accessed=B * D * 4 + weight_bytes + B * 4,
    )

    out_slab = pl.pallas_call(
        value_net_kernel,
        out_shape=jax.ShapeDtypeStruct((1, B), jnp.float32),
        grid_spec=pltpu.PrefetchScalarGridSpec(
            num_scalar_prefetch=0,
            grid=(num_tiles,),
            in_specs=in_specs,
            out_specs=out_spec,
        ),
        compiler_params=pltpu.CompilerParams(
            dimension_semantics=("parallel",),
            vmem_limit_bytes=32 * 1024 * 1024,
        ),
        cost_estimate=cost,
    )(x_c, w1_c, b1_c, w2_c, b2_c, w3_c, b3_c)

    # (1, B) -> (B, 1): same linear order, free reshape.
    return out_slab.reshape(B, 1)


# ------------------------ deterministic parameter init -------------------- #

def orthogonal(key, out_features, in_features, std):
    """Mimics torch.nn.init.orthogonal_(weight, gain=std) for a 2-D weight of
    shape (out_features, in_features)."""
    rows, cols = out_features, in_features
    flat = jax.random.normal(key, (rows, cols), dtype=jnp.float32)
    transposed = rows < cols
    if transposed:
        flat = flat.T
    q, r = jnp.linalg.qr(flat)
    d = jnp.sign(jnp.diagonal(r))          # sign fix for uniqueness
    q = q * d[None, :]
    if transposed:
        q = q.T
    return (std * q).astype(jnp.float32)   # (out, in)


def init_value_network(key, shape_in, hidden_size):
    k1, k2, k3 = jax.random.split(key, 3)
    std = 2.0 ** 0.5
    # torch Linear layout (out_features, in_features); biases and the final
    # head weight as (features, 1) columns (broadcast along lanes in-kernel).
    w1 = orthogonal(k1, hidden_size, shape_in, std)                    # (H, D)
    b1 = jnp.zeros((hidden_size, 1), jnp.float32)
    w2 = orthogonal(k2, hidden_size, hidden_size, std)                 # (H, H)
    b2 = jnp.zeros((hidden_size, 1), jnp.float32)
    w3 = orthogonal(k3, 1, hidden_size, 1.0).reshape(hidden_size, 1)   # (H, 1)
    b3 = jnp.zeros((1,), jnp.float32)
    return (w1, b1, w2, b2, w3, b3)


# ------------------------------ reference ---------------------------------- #

def value_network_ref(x, params):
    w1, b1, w2, b2, w3, b3 = params
    h = jnp.tanh(x @ w1.T + b1.T)
    h = jnp.tanh(h @ w2.T + b2.T)
    return h @ w3 + b3.reshape(1, 1)


# --------------------------------- main ------------------------------------ #

if __name__ == "__main__":
    shape_in = 17    # HalfCheetah observation dim
    hidden = 64      # module default hidden_size
    batch = 256

    key = jax.random.PRNGKey(0)
    k_params, k_x = jax.random.split(key)

    params = init_value_network(k_params, shape_in, hidden)
    x = jax.random.normal(k_x, (batch, shape_in), dtype=jnp.float32)

    ref = value_network_ref(x, params)

    # Default: single grid step (overhead-bound problem; nothing to pipeline).
    out = jax.block_until_ready(value_network_forward(x, params))
    assert out.shape == (batch, 1), out.shape
    err = float(jnp.max(jnp.abs(out - ref)))
    assert jnp.allclose(out, ref, atol=1e-4, rtol=1e-4), (
        f"single-tile mismatch vs reference: max abs err {err}")

    # Optional 2-way lane-dense batch split (useful only on v7x dual-TC;
    # exercises the multi-tile BlockSpec path).
    out2 = jax.block_until_ready(
        value_network_forward(x, params, batch_tile=128))
    err2 = float(jnp.max(jnp.abs(out2 - ref)))
    assert jnp.allclose(out2, ref, atol=1e-4, rtol=1e-4), (
        f"2-tile mismatch vs reference: max abs err {err2}")

    print("KERNEL_OK")
</pallas_src>

<mosaic_0001>
module attributes {stable_mosaic.version = 11 : i64} {
  func.func @value_net_kernel(%arg0: i32, %arg1: memref<256x17xf32, #tpu.memory_space<vmem>>, %arg2: memref<64x17xf32, #tpu.memory_space<vmem>>, %arg3: memref<64x1xf32, #tpu.memory_space<vmem>>, %arg4: memref<64x64xf32, #tpu.memory_space<vmem>>, %arg5: memref<64x1xf32, #tpu.memory_space<vmem>>, %arg6: memref<64x1xf32, #tpu.memory_space<vmem>>, %arg7: memref<1xf32, #tpu.memory_space<smem>>, %arg8: memref<1x256xf32, #tpu.memory_space<vmem>>) attributes {dimension_semantics = [#tpu.dimension_semantics<parallel>], iteration_bounds = array<i64: 1>, scalar_prefetch = 0 : i64, scratch_operands = 0 : i64, tpu.core_type = #tpu.core_type<tc>, window_params = [{transform_indices = @transform_0, window_bounds = array<i64: 256, 17>}, {pipeline_mode = #tpu.pipeline_mode<synchronous>, transform_indices = @transform_1, window_bounds = array<i64: 64, 17>}, {pipeline_mode = #tpu.pipeline_mode<synchronous>, transform_indices = @transform_2, window_bounds = array<i64: 64, 1>}, {pipeline_mode = #tpu.pipeline_mode<synchronous>, transform_indices = @transform_3, window_bounds = array<i64: 64, 64>}, {pipeline_mode = #tpu.pipeline_mode<synchronous>, transform_indices = @transform_4, window_bounds = array<i64: 64, 1>}, {pipeline_mode = #tpu.pipeline_mode<synchronous>, transform_indices = @transform_5, window_bounds = array<i64: 64, 1>}, {transform_indices = @transform_6, window_bounds = array<i64: 1>}, {transform_indices = @transform_7, window_bounds = array<i64: 1, 256>}]} {
    %c0 = arith.constant 0 : index
    %c0_0 = arith.constant 0 : index
    %0 = vector.load %arg1[%c0, %c0_0] : memref<256x17xf32, #tpu.memory_space<vmem>>, vector<256x17xf32>
    %c0_1 = arith.constant 0 : index
    %c0_2 = arith.constant 0 : index
    %1 = vector.load %arg2[%c0_1, %c0_2] : memref<64x17xf32, #tpu.memory_space<vmem>>, vector<64x17xf32>
    %cst = arith.constant dense<0.000000e+00> : vector<64x256xf32>
    %2 = tpu.matmul %1, %0, %cst {dimension_numbers = #tpu.dot_dimension_numbers<[1], [1], [0], [0], [0, 0, 1, 0], [], []>} : vector<64x17xf32>, vector<256x17xf32>, vector<64x256xf32> -> vector<64x256xf32>
    %c0_3 = arith.constant 0 : index
    %c0_4 = arith.constant 0 : index
    %3 = vector.load %arg3[%c0_3, %c0_4] : memref<64x1xf32, #tpu.memory_space<vmem>>, vector<64x1xf32>
    %4 = vector.broadcast %3 : vector<64x1xf32> to vector<64x256xf32>
    %5 = arith.addf %2, %4 : vector<64x256xf32>
    %6 = math.tanh %5 : vector<64x256xf32>
    %c0_5 = arith.constant 0 : index
    %c0_6 = arith.constant 0 : index
    %7 = vector.load %arg4[%c0_5, %c0_6] : memref<64x64xf32, #tpu.memory_space<vmem>>, vector<64x64xf32>
    %cst_7 = arith.constant dense<0.000000e+00> : vector<64x256xf32>
    %8 = tpu.matmul %7, %6, %cst_7 {dimension_numbers = #tpu.dot_dimension_numbers<[1], [0], [0], [1], [0, 0, 1, 1], [], []>} : vector<64x64xf32>, vector<64x256xf32>, vector<64x256xf32> -> vector<64x256xf32>
    %c0_8 = arith.constant 0 : index
    %c0_9 = arith.constant 0 : index
    %9 = vector.load %arg5[%c0_8, %c0_9] : memref<64x1xf32, #tpu.memory_space<vmem>>, vector<64x1xf32>
    %10 = vector.broadcast %9 : vector<64x1xf32> to vector<64x256xf32>
    %11 = arith.addf %8, %10 : vector<64x256xf32>
    %12 = math.tanh %11 : vector<64x256xf32>
    %c0_10 = arith.constant 0 : index
    %c0_11 = arith.constant 0 : index
    %13 = vector.load %arg6[%c0_10, %c0_11] : memref<64x1xf32, #tpu.memory_space<vmem>>, vector<64x1xf32>
    %14 = vector.broadcast %13 : vector<64x1xf32> to vector<64x256xf32>
    %15 = arith.mulf %12, %14 : vector<64x256xf32>
    %cst_12 = arith.constant dense<0.000000e+00> : vector<256xf32>
    %16 = vector.multi_reduction <add>, %15, %cst_12 [0] : vector<64x256xf32> to vector<256xf32>
    %17 = vector.shape_cast %16 : vector<256xf32> to vector<1x256xf32>
    %c0_13 = arith.constant 0 : index
    %18 = memref.load %arg7[%c0_13] : memref<1xf32, #tpu.memory_space<smem>>
    %19 = vector.broadcast %18 : f32 to vector<1x256xf32>
    %20 = arith.addf %17, %19 : vector<1x256xf32>
    %c0_14 = arith.constant 0 : index
    %c0_15 = arith.constant 0 : index
    %21 = vector.load %arg8[%c0_14, %c0_15] : memref<1x256xf32, #tpu.memory_space<vmem>>, vector<1x256xf32>
    tpu.vector_store %arg8[%c0_14, %c0_15], %20 {strides = array<i32>} : memref<1x256xf32, #tpu.memory_space<vmem>>, vector<1x256xf32>,
    return
  }
  func.func @transform_0(%arg0: i32) -> (i32, i32) {
    %c0_i32 = arith.constant 0 : i32
    %c0_i32_0 = arith.constant 0 : i32
    return %arg0, %c0_i32 : i32, i32
  }
  func.func @transform_1(%arg0: i32) -> (i32, i32) {
    %c0_i32 = arith.constant 0 : i32
    %c0_i32_0 = arith.constant 0 : i32
    %c0_i32_1 = arith.constant 0 : i32
    return %c0_i32, %c0_i32_0 : i32, i32
  }
  func.func @transform_2(%arg0: i32) -> (i32, i32) {
    %c0_i32 = arith.constant 0 : i32
    %c0_i32_0 = arith.constant 0 : i32
    %c0_i32_1 = arith.constant 0 : i32
    return %c0_i32, %c0_i32_0 : i32, i32
  }
  func.func @transform_3(%arg0: i32) -> (i32, i32) {
    %c0_i32 = arith.constant 0 : i32
    %c0_i32_0 = arith.constant 0 : i32
    %c0_i32_1 = arith.constant 0 : i32
    return %c0_i32, %c0_i32_0 : i32, i32
  }
  func.func @transform_4(%arg0: i32) -> (i32, i32) {
    %c0_i32 = arith.constant 0 : i32
    %c0_i32_0 = arith.constant 0 : i32
    %c0_i32_1 = arith.constant 0 : i32
    return %c0_i32, %c0_i32_0 : i32, i32
  }
  func.func @transform_5(%arg0: i32) -> (i32, i32) {
    %c0_i32 = arith.constant 0 : i32
    %c0_i32_0 = arith.constant 0 : i32
    %c0_i32_1 = arith.constant 0 : i32
    return %c0_i32, %c0_i32_0 : i32, i32
  }
  func.func @transform_6(%arg0: i32) -> i32 {
    %c0_i32 = arith.constant 0 : i32
    %c0_i32_0 = arith.constant 0 : i32
    return %c0_i32 : i32
  }
  func.func @transform_7(%arg0: i32) -> (i32, i32) {
    %c0_i32 = arith.constant 0 : i32
    %c0_i32_0 = arith.constant 0 : i32
    return %c0_i32, %arg0 : i32, i32
  }
}

</mosaic_0001>

<bundles_post_ra>
// kernel: tpu_custom_call.1
= control target key start
LH: loop header
LB: loop body
LE: loop exit
PB: predicated region body
PF: predicated region fallthrough
CT: control target
= control target key end

     0   :  { %vm116_vm0 = vcmask 138240   ;;  %v961_v7 = vmov 0   ;;  %s1310_s0 = inlined_call_operand.vmem [shape: f32[256,17], index: 0, kind: input, shape index: {}]   ;;  %s1311_s1 = inlined_call_operand.vmem [shape: f32[64,17], index: 1, kind: input, shape index: {}]   ;;  %s1312_s2 = inlined_call_operand.vmem [shape: f32[64,1], index: 2, kind: input, shape index: {}]   ;;  %s1313_s3 = inlined_call_operand.vmem [shape: f32[64,64], index: 3, kind: input, shape index: {}]   ;;  %s1314_s4 = inlined_call_operand.vmem [shape: f32[64,1], index: 4, kind: input, shape index: {}]   ;;  %s1315_s5 = inlined_call_operand.vmem [shape: f32[64,1], index: 5, kind: input, shape index: {}]   ;;  %s1316_s6 = inlined_call_operand.<no memory space> [shape: f32[1], index: 6, kind: input, shape index: {}]   ;;  %s1317_s7 = inlined_call_operand.hbm [shape: f32[1,256], index: 7, kind: output, shape index: {}]  }
   0x1   :  { %v44_v0 = vld [vmem:[%s1310_s0 + $0x80] sm:$0xff]  ;;  %v45_v1 = vld [vmem:[%s1310_s0 + $0x88] sm:$0xff]  ;;  %vm1016_vm1 = vmpackc.low %vm116_vm0, %vm116_vm0  ;;  %871 = vset.pattern.permute.xlu0 %v961_v7  ;;  %872 = vset.pattern.permute.xlu1 %v961_v7 }
   0x2   :  { %v28_v2 = vld [vmem:[%s1310_s0] sm:$0xff]  ;;  %v803_v3 = vpack.c.bf16 %v45_v1, %v44_v0  ;;  %v29_v5 = vld [vmem:[%s1310_s0 + $0x8] sm:$0xff]  ;;  %v46_v6 = vld [vmem:[%s1310_s0 + $0x90] sm:$0xff] }
   0x3   :  { %v806_v8 = vpack.c.bf16 %v29_v5, %v28_v2  ;;  %v47_v9 = vld [vmem:[%s1310_s0 + $0x98] sm:$0xff]  ;;  %v30_v11 = vld [vmem:[%s1310_s0 + $0x10] sm:$0xff]  ;;  %v48_v13 = vld [vmem:[%s1310_s0 + $0xa0] sm:$0xff] }
   0x4   :  { %805 = vmatprep.subr.msk.bf16.mxu0 %vm1016_vm1, %v803_v3  ;;  %v809_v10 = vpack.c.bf16 %v47_v9, %v46_v6  ;;  %v31_v12 = vld [vmem:[%s1310_s0 + $0x18] sm:$0xff]  ;;  %v49_v14 = vld [vmem:[%s1310_s0 + $0xa8] sm:$0xff]  ;;  %v1050_v17 = vld [vmem:[%s1311_s1] sm:$0xff] }
   0x5   :  { %808 = vmatpush3.bf16.xpose.msk.msra.mxu0 %vm1016_vm1, %v806_v8  ;;  %v812_v15 = vpack.c.bf16 %v31_v12, %v30_v11  ;;  %v815_v16 = vpack.c.bf16 %v49_v14, %v48_v13  ;;  %787 = vmatprep.mubr.msk.f32.mxu0 %vm116_vm0, %v1050_v17  ;;  %v32_v18 = vld [vmem:[%s1310_s0 + $0x20] sm:$0xff]  ;;  %v33_v19 = vld [vmem:[%s1310_s0 + $0x28] sm:$0xff]  ;;  %v50_v21 = vld [vmem:[%s1310_s0 + $0xb0] sm:$0xff] }
   0x6   :  { %811 = vmatprep.subr.msk.bf16.mxu0 %vm1016_vm1, %v809_v10  ;;  %v68_v20 = vld [vmem:[%s1312_s2] sm:$0xff]  ;;  %v51_v22 = vld [vmem:[%s1310_s0 + $0xb8] sm:$0xff]  ;;  %v70_v23 = vld [vmem:[%s1312_s2 + $0x10] sm:$0xff]  ;;  %v818_v25 = vpack.c.bf16 %v33_v19, %v32_v18 }
   0x7   :  { %78 = vperm.xlu0 %871, %v68_v20   ;;  %88 = vperm.xlu1 %872, %v70_v23   ;;  %v69_v24 = vld [vmem:[%s1312_s2 + $0x8] sm:$0xff]  ;;  %v71_v26 = vld [vmem:[%s1312_s2 + $0x18] sm:$0xff]  ;;  %v821_v27 = vpack.c.bf16 %v51_v22, %v50_v21  ;;  %v72_v28 = vld [vmem:[%s1312_s2 + $0x20] sm:$0xff] }
   0x8   :  { %v73_v29 = vld [vmem:[%s1312_s2 + $0x28] sm:$0xff]  ;;  %v34_v30 = vld [vmem:[%s1310_s0 + $0x30] sm:$0xff]  ;;  %v35_v31 = vld [vmem:[%s1310_s0 + $0x38] sm:$0xff] }
   0xb   :  { %83 = vperm.xlu0 %871, %v69_v24   ;;  %93 = vperm.xlu1 %872, %v71_v26  }
   0xd   :  { %814 = vmatpush3.bf16.xpose.msk.msra.mxu0 %vm1016_vm1, %v812_v15 }
   0xe   :  { %817 = vmatprep.subr.msk.bf16.mxu0 %vm1016_vm1, %v815_v16 }
  0x15   :  { %820 = vmatpush3.bf16.xpose.msk.msra.mxu0 %vm1016_vm1, %v818_v25 }
  0x16   :  { %823 = vmatprep.subr.msk.bf16.mxu0 %vm1016_vm1, %v821_v27 }
  0x17   :  { %13 = vsyncpa [#allocation4], 0  ;;  %v52_v32 = vld [vmem:[%s1310_s0 + $0xc0] sm:$0xff]  ;;  %v53_v33 = vld [vmem:[%s1310_s0 + $0xc8] sm:$0xff]  ;;  %98 = vperm.xlu0 %871, %v72_v28   ;;  %103 = vperm.xlu1 %872, %v73_v29   ;;  %v824_v35 = vpack.c.bf16 %v35_v31, %v34_v30  ;;  %v962_v18 = vmov 0.0   ;;  %vm422_vm2 = vcmask 523264  }
  0x18   :  { %v74_v34 = vld [vmem:[%s1312_s2 + $0x30] sm:$0xff]  ;;  %v75_v36 = vld [vmem:[%s1312_s2 + $0x38] sm:$0xff]  ;;  %v827_v37 = vpack.c.bf16 %v53_v33, %v52_v32  ;;  %v374_v38 = vld [vmem:[%s1314_s4] sm:$0xff]  ;;  %511 = vmatprep.mubr.f32.mxu1 %v962_v18  ;;  %s964_s21 = smov [#allocation3]  }
  0x19   :  { %v375_v39 = vld [vmem:[%s1314_s4 + $0x8] sm:$0xff]  ;;  %v36_v40 = vld [vmem:[%s1310_s0 + $0x40] sm:$0xff]  ;;  %v54_v42 = vld [vmem:[%s1310_s0 + $0xd0] sm:$0xff] }
  0x1a   :  { %v37_v41 = vld [vmem:[%s1310_s0 + $0x48] sm:$0xff]  ;;  %v55_v43 = vld [vmem:[%s1310_s0 + $0xd8] sm:$0xff]  ;;  %v376_v44 = vld [vmem:[%s1314_s4 + $0x10] sm:$0xff] }
  0x1b   :  { %108 = vperm.xlu0 %871, %v74_v34   ;;  %113 = vperm.xlu1 %872, %v75_v36   ;;  %v830_v45 = vpack.c.bf16 %v37_v41, %v36_v40  ;;  %v377_v46 = vld [vmem:[%s1314_s4 + $0x18] sm:$0xff]  ;;  %v833_v47 = vpack.c.bf16 %v55_v43, %v54_v42  ;;  %v378_v48 = vld [vmem:[%s1314_s4 + $0x20] sm:$0xff]  ;;  %v379_v49 = vld [vmem:[%s1314_s4 + $0x28] sm:$0xff] }
  0x1c   :  { %v38_v50 = vld [vmem:[%s1310_s0 + $0x50] sm:$0xff]  ;;  %v39_v51 = vld [vmem:[%s1310_s0 + $0x58] sm:$0xff]  ;;  %v56_v52 = vld [vmem:[%s1310_s0 + $0xe0] sm:$0xff] }
  0x1d   :  { %826 = vmatpush3.bf16.xpose.msk.msra.mxu0 %vm1016_vm1, %v824_v35  ;;  %v57_v53 = vld [vmem:[%s1310_s0 + $0xe8] sm:$0xff]  ;;  %v380_v54 = vld [vmem:[%s1314_s4 + $0x30] sm:$0xff]  ;;  %v836_v55 = vpack.c.bf16 %v39_v51, %v38_v50  ;;  %v381_v56 = vld [vmem:[%s1314_s4 + $0x38] sm:$0xff] }
  0x1e   :  { %829 = vmatprep.subr.msk.bf16.mxu0 %vm1016_vm1, %v827_v37  ;;  %v839_v57 = vpack.c.bf16 %v57_v53, %v56_v52  ;;  %v576_v58 = vld [vmem:[%s1315_s5] sm:$0xff]  ;;  %v577_v59 = vld [vmem:[%s1315_s5 + $0x8] sm:$0xff]  ;;  %v58_v62 = vld [vmem:[%s1310_s0 + $0xf0] sm:$0xff] }
  0x1f   :  { %384 = vperm.xlu0 %871, %v374_v38   ;;  %389 = vperm.xlu1 %872, %v375_v39   ;;  %v40_v60 = vld [vmem:[%s1310_s0 + $0x60] sm:$0xff]  ;;  %v41_v61 = vld [vmem:[%s1310_s0 + $0x68] sm:$0xff]  ;;  %v59_v63 = vld [vmem:[%s1310_s0 + $0xf8] sm:$0xff] }
  0x20   :  { %v578_v0 = vld [vmem:[%s1315_s5 + $0x10] sm:$0xff]  ;;  %v842_v1 = vpack.c.bf16 %v41_v61, %v40_v60  ;;  %v579_v2 = vld [vmem:[%s1315_s5 + $0x18] sm:$0xff]  ;;  %v845_v3 = vpack.c.bf16 %v59_v63, %v58_v62  ;;  %v580_v5 = vld [vmem:[%s1315_s5 + $0x20] sm:$0xff] }
  0x21   :  { %v581_v6 = vld [vmem:[%s1315_s5 + $0x28] sm:$0xff]  ;;  %v42_v7 = vld [vmem:[%s1310_s0 + $0x70] sm:$0xff]  ;;  %v43_v8 = vld [vmem:[%s1310_s0 + $0x78] sm:$0xff] }
  0x22   :  { %v582_v9 = vld [vmem:[%s1315_s5 + $0x30] sm:$0xff]  ;;  %v848_v10 = vpack.c.bf16 %v43_v8, %v42_v7  ;;  %v583_v11 = vld [vmem:[%s1315_s5 + $0x38] sm:$0xff]  ;;  %v61_v12 = vld [vmem:[%s1311_s1 + $0x8] sm:$0xff]  ;;  %s699_s5 = sshll.u32 %s964_s21, 4  ;;  %s700_s5 = int_to_ptr.vmem [resolvable:$true] %s699_s5 }
  0x23   :  { %394 = vperm.xlu0 %871, %v376_v44   ;;  %399 = vperm.xlu1 %872, %v377_v46   ;;  %v62_v13 = vld [vmem:[%s1311_s1 + $0x10] sm:$0xff]  ;;  %v63_v4 = vld [vmem:[%s1311_s1 + $0x18] sm:$0xff]  ;;  %v64_v14 = vld [vmem:[%s1311_s1 + $0x20] sm:$0xff]  ;;  %s937_s4 = scalar_lea.vmem %s700_s5, 32  ;;  %p942_p1 = scmp.lt.s32.totalorder %s700_s5, %s700_s5 }
  0x24   :  { %v65_v15 = vld [vmem:[%s1311_s1 + $0x28] sm:$0xff]  ;;  %v66_v16 = vld [vmem:[%s1311_s1 + $0x30] sm:$0xff]  ;;  %p938_p0 = scmp.ne.s32.totalorder %s700_s5, %s937_s4  ;;  %p943_p2 = scmp.lt.s32.totalorder %s937_s4, %s937_s4 }
  0x25   :  { %832 = vmatpush3.bf16.xpose.msk.msra.mxu0 %vm1016_vm1, %v830_v45 }
  0x26   :  { %835 = vmatprep.subr.msk.bf16.mxu0 %vm1016_vm1, %v833_v47  ;;  %p944_p3 = por %p943_p2, %p942_p1 }
  0x27   :  { %404 = vperm.xlu0 %871, %v378_v48   ;;  %409 = vperm.xlu1 %872, %v379_v49  }
  0x28   :  { %p945_p4 = pnand %p944_p3, %p938_p0 }
  0x2b   :  { %414 = vperm.xlu0 %871, %v380_v54   ;;  %419 = vperm.xlu1 %872, %v381_v56  }
  0x2d   :  { %838 = vmatpush3.bf16.xpose.msk.msra.mxu0 %vm1016_vm1, %v836_v55 }
  0x2e   :  { %841 = vmatprep.subr.msk.bf16.mxu0 %vm1016_vm1, %v839_v57 }
  0x2f   :  { %586 = vperm.xlu0 %871, %v576_v58   ;;  %591 = vperm.xlu1 %872, %v577_v59  }
  0x33   :  { %596 = vperm.xlu0 %871, %v578_v0   ;;  %601 = vperm.xlu1 %872, %v579_v2  }
  0x35   :  { %844 = vmatpush3.bf16.xpose.msk.msra.mxu0 %vm1016_vm1, %v842_v1 }
  0x36   :  { %847 = vmatprep.subr.msk.bf16.mxu0 %vm1016_vm1, %v845_v3 }
  0x37   :  { %606 = vperm.xlu0 %871, %v580_v5   ;;  %611 = vperm.xlu1 %872, %v581_v6  }
  0x3b   :  { %616 = vperm.xlu0 %871, %v582_v9   ;;  %621 = vperm.xlu1 %872, %v583_v11  }
  0x3d   :  { %850 = vmatpush3.bf16.xpose.msk.msra.mxu0 %vm1016_vm1, %v848_v10 }
  0x44   :  { %788 = vmatmul.mubr.msk.f32.vlgmr.msra.gmra.mrb[0].mxu0 %vm116_vm0, %v1050_v17  ;;  %v67_v17 = vld [vmem:[%s1311_s1 + $0x38] sm:$0xff] }
  0x45   :  { %789 = vmatprep.mubr.msk.f32.mxu0 %vm116_vm0, %v61_v12 }
  0x48   :  { %790 = vmatmul.mubr.msk.f32.gmra.mrb[2].mxu0 %vm116_vm0, %v61_v12 }
  0x49   :  { %791 = vmatprep.mubr.msk.f32.mxu0 %vm116_vm0, %v62_v13 }
  0x4c   :  { %792 = vmatmul.mubr.msk.f32.gmra.mrb[4].mxu0 %vm116_vm0, %v62_v13 }
  0x4d   :  { %793 = vmatprep.mubr.msk.f32.mxu0 %vm116_vm0, %v63_v4 }
  0x50   :  { %794 = vmatmul.mubr.msk.f32.gmra.mrb[6].mxu0 %vm116_vm0, %v63_v4 }
  0x51   :  { %795 = vmatprep.mubr.msk.f32.mxu0 %vm116_vm0, %v64_v14 }
  0x54   :  { %796 = vmatmul.mubr.msk.f32.gmra.mrb[8].mxu0 %vm116_vm0, %v64_v14 }
  0x55   :  { %797 = vmatprep.mubr.msk.f32.mxu0 %vm116_vm0, %v65_v15 }
  0x58   :  { %798 = vmatmul.mubr.msk.f32.gmra.mrb[10].mxu0 %vm116_vm0, %v65_v15 }
  0x59   :  { %799 = vmatprep.mubr.msk.f32.mxu0 %vm116_vm0, %v66_v16 }
  0x5c   :  { %800 = vmatmul.mubr.msk.f32.gmra.mrb[12].mxu0 %vm116_vm0, %v66_v16 }
  0x5d   :  { %801 = vmatprep.mubr.msk.f32.mxu0 %vm116_vm0, %v67_v17 }
  0x60   :  { %802 = vmatmul.mubr.msk.f32.gmra.mrb[14].mxu0 %vm116_vm0, %v67_v17 }
  0x86   :  { %v79_v19 = vpop.permute.xlu0 %78  ;;  %v89_v28 = vpop.permute.xlu1 %88 }
  0x8a   :  { %v84_v24 = vpop.permute.xlu0 %83  ;;  %v94_v34 = vpop.permute.xlu1 %93 }
  0x96   :  { %v99_v41 = vpop.permute.xlu0 %98  ;;  %v104_v50 = vpop.permute.xlu1 %103 }
  0x9a   :  { %v109_v57 = vpop.permute.xlu0 %108  ;;  %v114_v2 = vpop.permute.xlu1 %113 }
 0x117   :  { %v303_v20 = vpop.f32.mrb[0].mxu0 }
 0x118   :  { %v304_v21 = vadd.f32 %v303_v20, %v79_v19  ;;  %v305_v22 = vpop.f32.mrb[1].mxu0  ;;  %v366_v20 = vld [vmem:[%s1313_s3] sm:$0xff] }
 0x119   :  { %v306_v23 = vadd.f32 %v305_v22, %v79_v19  ;;  %v368_v22 = vld [vmem:[%s1313_s3 + $0x10] sm:$0xff] }
 0x11a   :  { %873 = vtanh.f32 %v304_v21  ;;  %v367_v21 = vld [vmem:[%s1313_s3 + $0x8] sm:$0xff] }
 0x11b   :  { %v309_v25 = vpop.f32.mrb[2].mxu0  ;;  %875 = vtanh.f32 %v306_v23  ;;  %v369_v23 = vld [vmem:[%s1313_s3 + $0x18] sm:$0xff] }
 0x11c   :  { %v310_v26 = vadd.f32 %v309_v25, %v84_v24  ;;  %v311_v27 = vpop.f32.mrb[3].mxu0  ;;  %v371_v25 = vld [vmem:[%s1313_s3 + $0x28] sm:$0xff] }
 0x11d   :  { %v312_v29 = vadd.f32 %v311_v27, %v84_v24  ;;  %v370_v24 = vld [vmem:[%s1313_s3 + $0x20] sm:$0xff]  ;;  %v373_v27 = vld [vmem:[%s1313_s3 + $0x38] sm:$0xff] }
 0x11e   :  { %877 = vtanh.f32 %v310_v26  ;;  %v372_v26 = vld [vmem:[%s1313_s3 + $0x30] sm:$0xff] }
 0x11f   :  { %879 = vtanh.f32 %v312_v29  ;;  %v315_v30 = vpop.f32.mrb[4].mxu0  ;;  %v390_v29 = vpop.permute.xlu1 %389 }
 0x120   :  { %v316_v31 = vadd.f32 %v315_v30, %v89_v28  ;;  %v317_v32 = vpop.f32.mrb[5].mxu0 }
 0x121   :  { %v318_v33 = vadd.f32 %v317_v32, %v89_v28  ;;  %v385_v28 = vpop.permute.xlu0 %384 }
 0x122   :  { %881 = vtanh.f32 %v316_v31 }
 0x123   :  { %v321_v35 = vpop.f32.mrb[6].mxu0  ;;  %883 = vtanh.f32 %v318_v33  ;;  %v400_v31 = vpop.permute.xlu1 %399 }
 0x124   :  { %v322_v36 = vadd.f32 %v321_v35, %v94_v34  ;;  %v323_v37 = vpop.f32.mrb[7].mxu0  ;;  %v874_v39 = vpop.eup %873 }
 0x125   :  { %v324_v38 = vadd.f32 %v323_v37, %v94_v34  ;;  %v876_v40 = vpop.eup %875  ;;  %v395_v30 = vpop.permute.xlu0 %394 }
 0x126   :  { %885 = vtanh.f32 %v322_v36 }
 0x127   :  { %887 = vtanh.f32 %v324_v38  ;;  %v327_v42 = vpop.f32.mrb[8].mxu0  ;;  %v410_v38 = vpop.permute.xlu1 %409 }
 0x128   :  { %v878_v43 = vpop.eup %877  ;;  %v328_v44 = vadd.f32 %v327_v42, %v99_v41  ;;  %v329_v45 = vpop.f32.mrb[9].mxu0 }
 0x129   :  { %v880_v46 = vpop.eup %879  ;;  %v330_v47 = vadd.f32 %v329_v45, %v99_v41  ;;  %v853_v48 = vpack.c.bf16 %v878_v43, %v874_v39  ;;  %v405_v36 = vpop.permute.xlu0 %404 }
 0x12a   :  { %v851_v49 = vpack.c.bf16 %v880_v46, %v876_v40  ;;  %889 = vtanh.f32 %v328_v44 }
 0x12b   :  { %v333_v51 = vpop.f32.mrb[10].mxu0  ;;  %891 = vtanh.f32 %v330_v47  ;;  %v420_v46 = vpop.permute.xlu1 %419 }
 0x12c   :  { %v334_v52 = vadd.f32 %v333_v51, %v104_v50  ;;  %v335_v53 = vpop.f32.mrb[11].mxu0  ;;  %852 = vmatprep.subr.bf16.mxu1 %v851_v49  ;;  %v882_v55 = vpop.eup %881 }
 0x12d   :  { %v336_v54 = vadd.f32 %v335_v53, %v104_v50  ;;  %854 = vmatpush1.bf16.msra.mxu1 %v853_v48  ;;  %v884_v56 = vpop.eup %883  ;;  %v415_v42 = vpop.permute.xlu0 %414 }
 0x12e   :  { %893 = vtanh.f32 %v334_v52 }
 0x12f   :  { %895 = vtanh.f32 %v336_v54  ;;  %v339_v58 = vpop.f32.mrb[12].mxu0 }
 0x130   :  { %v886_v59 = vpop.eup %885  ;;  %v340_v60 = vadd.f32 %v339_v58, %v109_v57  ;;  %v341_v61 = vpop.f32.mrb[13].mxu0 }
 0x131   :  { %v888_v62 = vpop.eup %887  ;;  %v342_v63 = vadd.f32 %v341_v61, %v109_v57  ;;  %v857_v0 = vpack.c.bf16 %v886_v59, %v882_v55  ;;  %v587_v52 = vpop.permute.xlu0 %586 }
 0x132   :  { %v855_v1 = vpack.c.bf16 %v888_v62, %v884_v56  ;;  %897 = vtanh.f32 %v340_v60  ;;  %v592_v56 = vpop.permute.xlu1 %591 }
 0x133   :  { %v345_v3 = vpop.f32.mrb[14].mxu0  ;;  %899 = vtanh.f32 %v342_v63 }
 0x134   :  { %v346_v5 = vadd.f32 %v345_v3, %v114_v2  ;;  %v347_v6 = vpop.f32.mrb[15].mxu0  ;;  %856 = vmatprep.subr.bf16.mxu1 %v855_v1  ;;  %v890_v8 = vpop.eup %889 }
 0x135   :  { %v348_v7 = vadd.f32 %v347_v6, %v114_v2  ;;  %858 = vmatpush1.bf16.msra.mxu1 %v857_v0  ;;  %v892_v9 = vpop.eup %891 }
 0x136   :  { %901 = vtanh.f32 %v346_v5  ;;  %v597_v5 = vpop.permute.xlu0 %596 }
 0x137   :  { %903 = vtanh.f32 %v348_v7 }
 0x138   :  { %v894_v10 = vpop.eup %893 }
 0x139   :  { %v896_v11 = vpop.eup %895  ;;  %v861_v12 = vpack.c.bf16 %v894_v10, %v890_v8 }
 0x13a   :  { %v859_v13 = vpack.c.bf16 %v896_v11, %v892_v9 }
 0x13c   :  { %860 = vmatprep.subr.bf16.mxu1 %v859_v13  ;;  %v898_v4 = vpop.eup %897 }
 0x13d   :  { %862 = vmatpush1.bf16.msra.mxu1 %v861_v12  ;;  %v900_v14 = vpop.eup %899 }
 0x140   :  { %v902_v15 = vpop.eup %901 }
 0x141   :  { %v904_v16 = vpop.eup %903  ;;  %v865_v17 = vpack.c.bf16 %v902_v15, %v898_v4  ;;  %v602_v15 = vpop.permute.xlu1 %601 }
 0x142   :  { %v863_v19 = vpack.c.bf16 %v904_v16, %v900_v14 }
 0x144   :  { %864 = vmatprep.subr.bf16.mxu1 %v863_v19 }
 0x145   :  { %866 = vmatpush1.bf16.msra.mxu1 %v865_v17 }
 0x148   :  { %747 = vmatmul.mubr.msk.f32.vlgmr.msra.gmra.mrb[0].mxu1 %vm422_vm2, %v366_v20 }
 0x149   :  { %517 = vmatprep.mubr.f32.mxu1 %v962_v18 }
 0x14c   :  { %748 = vmatmul.mubr.msk.f32.gmra.mrb[2].mxu1 %vm422_vm2, %v367_v21 }
 0x14d   :  { %523 = vmatprep.mubr.f32.mxu1 %v962_v18 }
 0x150   :  { %749 = vmatmul.mubr.msk.f32.gmra.mrb[4].mxu1 %vm422_vm2, %v368_v22 }
 0x151   :  { %529 = vmatprep.mubr.f32.mxu1 %v962_v18 }
 0x154   :  { %750 = vmatmul.mubr.msk.f32.gmra.mrb[6].mxu1 %vm422_vm2, %v369_v23 }
 0x155   :  { %535 = vmatprep.mubr.f32.mxu1 %v962_v18 }
 0x158   :  { %751 = vmatmul.mubr.msk.f32.gmra.mrb[8].mxu1 %vm422_vm2, %v370_v24 }
 0x159   :  { %541 = vmatprep.mubr.f32.mxu1 %v962_v18 }
 0x15c   :  { %752 = vmatmul.mubr.msk.f32.gmra.mrb[10].mxu1 %vm422_vm2, %v371_v25 }
 0x15d   :  { %547 = vmatprep.mubr.f32.mxu1 %v962_v18 }
 0x160   :  { %753 = vmatmul.mubr.msk.f32.gmra.mrb[12].mxu1 %vm422_vm2, %v372_v26 }
 0x161   :  { %553 = vmatprep.mubr.f32.mxu1 %v962_v18 }
 0x164   :  { %754 = vmatmul.mubr.msk.f32.gmra.mrb[14].mxu1 %vm422_vm2, %v373_v27  ;;  %v607_v27 = vpop.permute.xlu0 %606 }
 0x21b   :  { %v513_v32 = vpop.f32.mrb[0].mxu1 }
 0x21c   :  { %v514_v33 = vadd.f32 %v513_v32, %v385_v28  ;;  %v515_v34 = vpop.f32.mrb[1].mxu1 }
 0x21d   :  { %v516_v35 = vadd.f32 %v515_v34, %v385_v28 }
 0x21e   :  { %905 = vtanh.f32 %v514_v33 }
 0x21f   :  { %v519_v37 = vpop.f32.mrb[2].mxu1  ;;  %907 = vtanh.f32 %v516_v35 }
 0x220   :  { %v520_v39 = vadd.f32 %v519_v37, %v390_v29  ;;  %v521_v18 = vpop.f32.mrb[3].mxu1  ;;  %v612_v37 = vpop.permute.xlu1 %611 }
 0x221   :  { %v522_v40 = vadd.f32 %v521_v18, %v390_v29 }
 0x222   :  { %909 = vtanh.f32 %v520_v39 }
 0x223   :  { %911 = vtanh.f32 %v522_v40  ;;  %v525_v41 = vpop.f32.mrb[4].mxu1 }
 0x224   :  { %v526_v43 = vadd.f32 %v525_v41, %v395_v30  ;;  %v527_v44 = vpop.f32.mrb[5].mxu1 }
 0x225   :  { %v528_v45 = vadd.f32 %v527_v44, %v395_v30 }
 0x226   :  { %913 = vtanh.f32 %v526_v43  ;;  %v617_v43 = vpop.permute.xlu0 %616 }
 0x227   :  { %915 = vtanh.f32 %v528_v45  ;;  %v531_v47 = vpop.f32.mrb[6].mxu1 }
 0x228   :  { %v532_v48 = vadd.f32 %v531_v47, %v400_v31  ;;  %v533_v49 = vpop.f32.mrb[7].mxu1  ;;  %v906_v51 = vpop.eup %905 }
 0x229   :  { %v534_v50 = vadd.f32 %v533_v49, %v400_v31  ;;  %v908_v53 = vpop.eup %907  ;;  %v624_v60 = vmul.f32 %v906_v51, %v587_v52 }
 0x22a   :  { %917 = vtanh.f32 %v532_v48  ;;  %v625_v63 = vmul.f32 %v908_v53, %v587_v52 }
 0x22b   :  { %919 = vtanh.f32 %v534_v50  ;;  %v537_v54 = vpop.f32.mrb[8].mxu1 }
 0x22c   :  { %v910_v55 = vpop.eup %909  ;;  %v538_v57 = vadd.f32 %v537_v54, %v405_v36  ;;  %v539_v58 = vpop.f32.mrb[9].mxu1 }
 0x22d   :  { %v912_v59 = vpop.eup %911  ;;  %v626_v61 = vmul.f32 %v910_v55, %v592_v56  ;;  %v540_v62 = vadd.f32 %v539_v58, %v405_v36 }
 0x22e   :  { %v627_v0 = vmul.f32 %v912_v59, %v592_v56  ;;  %921 = vtanh.f32 %v538_v57 }
 0x22f   :  { %v640_v1 = vadd.f32 %v626_v61, %v624_v60  ;;  %923 = vtanh.f32 %v540_v62  ;;  %v543_v2 = vpop.f32.mrb[10].mxu1 }
 0x230   :  { %v914_v3 = vpop.eup %913  ;;  %v653_v6 = vadd.f32 %v627_v0, %v625_v63  ;;  %v544_v7 = vadd.f32 %v543_v2, %v410_v38  ;;  %v545_v8 = vpop.f32.mrb[11].mxu1  ;;  %v963_v63 = vmov 1966171168  }
 0x231   :  { %v916_v9 = vpop.eup %915  ;;  %v628_v10 = vmul.f32 %v914_v3, %v597_v5  ;;  %v546_v11 = vadd.f32 %v545_v8, %v410_v38  ;;  %v674_v0 = vunpack.c.l.s4 %v963_v63 }
 0x232   :  { %v629_v12 = vmul.f32 %v916_v9, %v597_v5  ;;  %925 = vtanh.f32 %v544_v7  ;;  %v667_v7 = vstv %s1316_s6 }
 0x233   :  { %v641_v13 = vadd.f32 %v640_v1, %v628_v10  ;;  %927 = vtanh.f32 %v546_v11  ;;  %v549_v4 = vpop.f32.mrb[12].mxu1  ;;  %v676_v1 = vlaneseq  ;;  %v675_v8 = vunpack.c.0.s8 %v674_v0 }
 0x234   :  { %v918_v14 = vpop.eup %917  ;;  %v654_v16 = vadd.f32 %v653_v6, %v629_v12  ;;  %v550_v17 = vadd.f32 %v549_v4, %v415_v42  ;;  %v551_v19 = vpop.f32.mrb[13].mxu1 }
 0x235   :  { %v920_v20 = vpop.eup %919  ;;  %v630_v21 = vmul.f32 %v918_v14, %v602_v15  ;;  %v552_v22 = vadd.f32 %v551_v19, %v415_v42  ;;  %v677_v9 = vshrl.u32 %v676_v1, 7  ;;  %vm690_vm3 = vcmp.lt.s32.totalorder %v676_v1, 256 }
 0x236   :  { %v631_v23 = vmul.f32 %v920_v20, %v602_v15  ;;  %929 = vtanh.f32 %v550_v17 }
 0x237   :  { %v642_v24 = vadd.f32 %v641_v13, %v630_v21  ;;  %931 = vtanh.f32 %v552_v22  ;;  %v555_v25 = vpop.f32.mrb[14].mxu1  ;;  %v678_v4 = vsub.s32 %v675_v8, %v677_v9 }
 0x238   :  { %v922_v26 = vpop.eup %921  ;;  %v655_v28 = vadd.f32 %v654_v16, %v631_v23  ;;  %v556_v29 = vadd.f32 %v555_v25, %v420_v46  ;;  %v557_v30 = vpop.f32.mrb[15].mxu1 }
 0x239   :  { %v924_v31 = vpop.eup %923  ;;  %v632_v32 = vmul.f32 %v922_v26, %v607_v27  ;;  %v558_v33 = vadd.f32 %v557_v30, %v420_v46  ;;  %v622_v46 = vpop.permute.xlu1 %621 }
 0x23a   :  { %v633_v34 = vmul.f32 %v924_v31, %v607_v27  ;;  %933 = vtanh.f32 %v556_v29 }
 0x23b   :  { %v643_v35 = vadd.f32 %v642_v24, %v632_v32  ;;  %935 = vtanh.f32 %v558_v33 }
 0x23c   :  { %v926_v36 = vpop.eup %925  ;;  %v656_v38 = vadd.f32 %v655_v28, %v633_v34 }
 0x23d   :  { %v928_v39 = vpop.eup %927  ;;  %v634_v18 = vmul.f32 %v926_v36, %v612_v37 }
 0x23e   :  { %v635_v40 = vmul.f32 %v928_v39, %v612_v37 }
 0x23f   :  { %v644_v41 = vadd.f32 %v643_v35, %v634_v18 }
 0x240   :  { %v930_v42 = vpop.eup %929  ;;  %v657_v44 = vadd.f32 %v656_v38, %v635_v40 }
 0x241   :  { %v932_v45 = vpop.eup %931  ;;  %v636_v47 = vmul.f32 %v930_v42, %v617_v43 }
 0x242   :  { %v637_v48 = vmul.f32 %v932_v45, %v617_v43 }
 0x243   :  { %v645_v49 = vadd.f32 %v644_v41, %v636_v47 }
 0x244   :  { %v934_v50 = vpop.eup %933  ;;  %v658_v51 = vadd.f32 %v657_v44, %v637_v48 }
 0x245   :  { %v936_v52 = vpop.eup %935  ;;  %v638_v53 = vmul.f32 %v934_v50, %v622_v46 }
 0x246   :  { %v639_v54 = vmul.f32 %v936_v52, %v622_v46 }
 0x247   :  { %v646_v55 = vadd.f32 %v645_v49, %v638_v53 }
 0x248   :  { %v659_v56 = vadd.f32 %v658_v51, %v639_v54 }
 0x249   :  { %v647_v57 = vrot.slane %v646_v55, 4 }
 0x24a   :  { %v660_v58 = vrot.slane %v659_v56, 4 }
 0x24b   :  { %v648_v59 = vadd.f32 %v647_v57, %v646_v55 }
 0x24c   :  { %v661_v60 = vadd.f32 %v660_v58, %v659_v56 }
 0x24d   :  { %v649_v61 = vrot.slane %v648_v59, 2 }
 0x24e   :  { %v662_v62 = vrot.slane %v661_v60, 2 }
 0x24f   :  { %v650_v2 = vadd.f32 %v649_v61, %v648_v59 }
 0x250   :  { %v663_v3 = vadd.f32 %v662_v62, %v661_v60 }
 0x251   :  { %v651_v5 = vrot.slane %v650_v2, 1 }
 0x252   :  { %v664_v6 = vrot.slane %v663_v3, 1 }
 0x253   :  { %v652_v10 = vadd.f32 %v651_v5, %v650_v2 }
 0x254   :  { %v665_v11 = vadd.f32 %v664_v6, %v663_v3 }
 0x255   :  { %v668_v12 = vadd.f32 %v667_v7, %v652_v10 }
 0x256   :  { %v669_v13 = vadd.f32 %v667_v7, %v665_v11 }
 0x258   :  { %v672_v14 = vcombine.low %v668_v12, %v669_v13 }
 0x25a   :  { %v679_v15 = vrot.slane %v672_v14, %v678_v4 }
 0x25c   :  { %v686_v16 = vrot.slane %v679_v15, %v678_v4 }
 0x25e   :  { %692 = vst.msk [vmem:[#allocation3] sm:$0x3] %vm690_vm3, %v686_v16 }
 0x25f   :  { %948 = shalt.err (!%p945_p4)
}
 0x260   :  { %s949_s23 = scalar_lea.hbm %s1317_s7, 32 }
 0x261   :  { %p950_p5 = scmp.ne.s32.totalorder %s1317_s7, %s949_s23  ;;  %p953_p6 = scmp.lt.u32.totalorder %s949_s23, %s1317_s7 }
 0x263   :  { %p955_p7 = pnand %p953_p6, %p950_p5 }
 0x265   :  { %958 = shalt.err (!%p955_p7)
}
 0x266   :  { %702 = dma.vmem_to_hbm [thread:$0]  %s700_s5, 32, %s1317_s7, [#allocation4]  }
 0x267   :  { %959 = dma.done.wait [#allocation4], 32  }
 0x268   :  { %960 = vsyncadd [#allocation4], 4294967264 }
 0x269   :  { %706 = vsyncpa [#allocation4], 1 }

</bundles_post_ra>
